<compile_context>
chip_gen: v7x
topology: tpu7x:2x2x1
jax: 0.10.0
libtpu: 0.0.40
codegen_flags: <defaults>
</compile_context>

<pallas_src>
import functools

import jax
import jax.numpy as jnp
from jax.experimental import pallas as pl
from jax.experimental.pallas import tpu as pltpu


def _round_up(x: int, m: int) -> int:
    return (x + m - 1) // m * m


def residual_linear_kernel(x_ref, w_ref, b_ref, o_ref, acc_ref, *, tk: int):
    # x_ref:   (TM, TK)      input slab (rows i, contraction slab k)
    # w_ref:   (TK, D_pad)   weight slab for contraction slab k
    # b_ref:   (1, D_pad)    bias (same block for every grid step)
    # o_ref:   (TM, D_pad)   output row tile (written once, at the last k)
    # acc_ref: (TM, D_pad)   f32 accumulator scratch
    k = pl.program_id(1)

    @pl.when(k == 0)
    def _init():
        acc_ref[...] = jnp.zeros_like(acc_ref)

    x = x_ref[...]
    acc_ref[...] += jnp.dot(x, w_ref[...], preferred_element_type=jnp.float32)

    # Residual: fn is a square Linear(D, D), so the input columns of this K
    # slab correspond to the same output columns — add them in place (x is
    # only read from HBM once this way).
    col = pl.multiple_of(k * tk, tk)
    acc_ref[:, pl.ds(col, tk)] += x.astype(jnp.float32)

    @pl.when(k == pl.num_programs(1) - 1)
    def _finalize():
        o_ref[...] = (acc_ref[...] + b_ref[...].astype(jnp.float32)).astype(o_ref.dtype)


def residual_apply(x, w, b, *, tm: int = 256, tk: int = 256):
    """Computes Linear(x) + x with a fused, tiled Pallas TPU kernel.

    x: (B, S, D)
    w: (D, D)   (fn weight, applied as x @ w)
    b: (D,)     (fn bias)
    """
    B, S, D = x.shape
    M = B * S
    dtype = x.dtype
    itemsize = jnp.dtype(dtype).itemsize

    # Lane-dense padding of the hidden dim; 128-aligned tiles everywhere.
    D_pad = _round_up(D, 128)
    TK = tk if D_pad % tk == 0 else 128
    TM = tm if M >= tm else _round_up(M, 8)
    M_pad = _round_up(M, TM)

    x2d = jnp.pad(x.reshape(M, D), ((0, M_pad - M), (0, D_pad - D)))
    w_p = jnp.pad(w, ((0, D_pad - D), (0, D_pad - D)))
    b_p = jnp.pad(b.reshape(1, D), ((0, 0), (0, D_pad - D)))

    num_m = M_pad // TM
    num_k = D_pad // TK

    # Rough VMEM budget: double-buffered in/out blocks + f32 accumulator.
    vmem_bytes = (
        2 * (TM * TK + TK * D_pad + D_pad + TM * D_pad) * itemsize
        + TM * D_pad * 4
        + (2 << 20)
    )
    vmem_limit = int(max(vmem_bytes, 32 * 1024 * 1024))

    kernel = functools.partial(residual_linear_kernel, tk=TK)

    out2d = pl.pallas_call(
        kernel,
        out_shape=jax.ShapeDtypeStruct((M_pad, D_pad), dtype),
        grid_spec=pltpu.PrefetchScalarGridSpec(
            num_scalar_prefetch=0,
            grid=(num_m, num_k),
            in_specs=[
                pl.BlockSpec((TM, TK), lambda i, k: (i, k)),       # x slab
                pl.BlockSpec((TK, D_pad), lambda i, k: (k, 0)),    # w slab
                pl.BlockSpec((1, D_pad), lambda i, k: (0, 0)),     # bias (resident)
            ],
            out_specs=pl.BlockSpec((TM, D_pad), lambda i, k: (i, 0)),
            scratch_shapes=[pltpu.VMEM((TM, D_pad), jnp.float32)],
        ),
        compiler_params=pltpu.CompilerParams(
            dimension_semantics=("parallel", "arbitrary"),
            vmem_limit_bytes=vmem_limit,
        ),
        cost_estimate=pl.CostEstimate(
            flops=2 * M_pad * D_pad * D_pad + 2 * M_pad * D_pad,
            transcendentals=0,
            bytes_accessed=(
                M_pad * D_pad                    # x read once
                + num_m * D_pad * D_pad          # weight re-read per row tile
                + D_pad                          # bias
                + M_pad * D_pad                  # output
            ) * itemsize,
        ),
    )(x2d, w_p, b_p)

    return out2d[:M, :D].reshape(B, S, D)


if __name__ == "__main__":
    key = jax.random.PRNGKey(0)
    kx, kw, kb = jax.random.split(key, 3)

    B, S, D = 2, 8, 32
    x = jax.random.normal(kx, (B, S, D), dtype=jnp.float32)
    # Deterministic parameter init for the wrapped fn (Linear(D, D)).
    w = jax.random.normal(kw, (D, D), dtype=jnp.float32) * (1.0 / jnp.sqrt(D))
    b = jax.random.normal(kb, (D,), dtype=jnp.float32) * 0.01

    out = residual_apply(x, w, b)
    jax.block_until_ready(out)

    # Reference check: fn(x) + x in plain JAX.
    ref = jnp.einsum("bsd,de->bse", x, w) + b + x
    assert jnp.allclose(out, ref, atol=1e-4, rtol=1e-4), "mismatch vs reference"

    print("KERNEL_OK")
</pallas_src>

<mosaic_0001>
module attributes {stable_mosaic.version = 11 : i64} {
  func.func @residual_linear_kernel(%arg0: i32, %arg1: i32, %arg2: memref<16x128xf32, #tpu.memory_space<vmem>>, %arg3: memref<128x128xf32, #tpu.memory_space<vmem>>, %arg4: memref<1x128xf32, #tpu.memory_space<vmem>>, %arg5: memref<16x128xf32, #tpu.memory_space<vmem>>, %arg6: memref<16x128xf32, #tpu.memory_space<vmem>>) attributes {dimension_semantics = [#tpu.dimension_semantics<parallel>, #tpu.dimension_semantics<arbitrary>], iteration_bounds = array<i64: 1, 1>, scalar_prefetch = 0 : i64, scratch_operands = 1 : i64, tpu.core_type = #tpu.core_type<tc>, window_params = [{transform_indices = @transform_0, window_bounds = array<i64: 16, 128>}, {transform_indices = @transform_1, window_bounds = array<i64: 128, 128>}, {pipeline_mode = #tpu.pipeline_mode<synchronous>, transform_indices = @transform_2, window_bounds = array<i64: 1, 128>}, {transform_indices = @transform_3, window_bounds = array<i64: 16, 128>}]} {
    %c0_i32 = arith.constant 0 : i32
    %0 = arith.cmpi eq, %arg1, %c0_i32 : i32
    %1 = arith.extui %0 : i1 to i32
    %c0_i32_0 = arith.constant 0 : i32
    %2 = arith.cmpi ne, %1, %c0_i32_0 : i32
    scf.if %2 {
      %cst_12 = arith.constant 0.000000e+00 : f32
      %19 = vector.broadcast %cst_12 : f32 to vector<16x128xf32>
      %c0_13 = arith.constant 0 : index
      %c0_14 = arith.constant 0 : index
      %20 = vector.load %arg6[%c0_13, %c0_14] : memref<16x128xf32, #tpu.memory_space<vmem>>, vector<16x128xf32>
      tpu.vector_store %arg6[%c0_13, %c0_14], %19 {strides = array<i32>} : memref<16x128xf32, #tpu.memory_space<vmem>>, vector<16x128xf32>,
    } else {
    }
    %c0 = arith.constant 0 : index
    %c0_1 = arith.constant 0 : index
    %3 = vector.load %arg2[%c0, %c0_1] : memref<16x128xf32, #tpu.memory_space<vmem>>, vector<16x128xf32>
    %c0_2 = arith.constant 0 : index
    %c0_3 = arith.constant 0 : index
    %4 = vector.load %arg6[%c0_2, %c0_3] : memref<16x128xf32, #tpu.memory_space<vmem>>, vector<16x128xf32>
    %c0_4 = arith.constant 0 : index
    %c0_5 = arith.constant 0 : index
    %5 = vector.load %arg3[%c0_4, %c0_5] : memref<128x128xf32, #tpu.memory_space<vmem>>, vector<128x128xf32>
    %cst = arith.constant dense<0.000000e+00> : vector<16x128xf32>
    %6 = tpu.matmul %3, %5, %cst {dimension_numbers = #tpu.dot_dimension_numbers<[1], [0], [0], [1], [0, 0, 1, 1], [], []>} : vector<16x128xf32>, vector<128x128xf32>, vector<16x128xf32> -> vector<16x128xf32>
    %7 = arith.addf %4, %6 : vector<16x128xf32>
    %c0_6 = arith.constant 0 : index
    %c0_7 = arith.constant 0 : index
    %8 = vector.load %arg6[%c0_6, %c0_7] : memref<16x128xf32, #tpu.memory_space<vmem>>, vector<16x128xf32>
    tpu.vector_store %arg6[%c0_6, %c0_7], %7 {strides = array<i32>} : memref<16x128xf32, #tpu.memory_space<vmem>>, vector<16x128xf32>,
    %c128_i32 = arith.constant 128 : i32
    %9 = arith.muli %arg1, %c128_i32 : i32
    %10 = tpu.assume_multiple %9, 128 : i32
    %c0_8 = arith.constant 0 : index
    %11 = arith.index_cast %10 : i32 to index
    %12 = vector.load %arg6[%c0_8, %11] : memref<16x128xf32, #tpu.memory_space<vmem>>, vector<16x128xf32>
    %13 = arith.addf %12, %3 : vector<16x128xf32>
    %c0_9 = arith.constant 0 : index
    %14 = arith.index_cast %10 : i32 to index
    %15 = vector.load %arg6[%c0_9, %14] : memref<16x128xf32, #tpu.memory_space<vmem>>, vector<16x128xf32>
    tpu.vector_store %arg6[%c0_9, %14], %13 {strides = array<i32>} : memref<16x128xf32, #tpu.memory_space<vmem>>, vector<16x128xf32>,
    %c0_i32_10 = arith.constant 0 : i32
    %16 = arith.cmpi eq, %arg1, %c0_i32_10 : i32
    %17 = arith.extui %16 : i1 to i32
    %c0_i32_11 = arith.constant 0 : i32
    %18 = arith.cmpi ne, %17, %c0_i32_11 : i32
    scf.if %18 {
      %c0_12 = arith.constant 0 : index
      %c0_13 = arith.constant 0 : index
      %19 = vector.load %arg6[%c0_12, %c0_13] : memref<16x128xf32, #tpu.memory_space<vmem>>, vector<16x128xf32>
      %c0_14 = arith.constant 0 : index
      %c0_15 = arith.constant 0 : index
      %20 = vector.load %arg4[%c0_14, %c0_15] : memref<1x128xf32, #tpu.memory_space<vmem>>, vector<1x128xf32>
      %21 = vector.broadcast %20 : vector<1x128xf32> to vector<16x128xf32>
      %22 = arith.addf %19, %21 : vector<16x128xf32>
      %c0_16 = arith.constant 0 : index
      %c0_17 = arith.constant 0 : index
      %23 = vector.load %arg5[%c0_16, %c0_17] : memref<16x128xf32, #tpu.memory_space<vmem>>, vector<16x128xf32>
      tpu.vector_store %arg5[%c0_16, %c0_17], %22 {strides = array<i32>} : memref<16x128xf32, #tpu.memory_space<vmem>>, vector<16x128xf32>,
    } else {
    }
    return
  }
  func.func @transform_0(%arg0: i32, %arg1: i32) -> (i32, i32) {
    %c0_i32 = arith.constant 0 : i32
    return %arg0, %arg1 : i32, i32
  }
  func.func @transform_1(%arg0: i32, %arg1: i32) -> (i32, i32) {
    %c0_i32 = arith.constant 0 : i32
    %c0_i32_0 = arith.constant 0 : i32
    return %arg1, %c0_i32 : i32, i32
  }
  func.func @transform_2(%arg0: i32, %arg1: i32) -> (i32, i32) {
    %c0_i32 = arith.constant 0 : i32
    %c0_i32_0 = arith.constant 0 : i32
    %c0_i32_1 = arith.constant 0 : i32
    return %c0_i32, %c0_i32_0 : i32, i32
  }
  func.func @transform_3(%arg0: i32, %arg1: i32) -> (i32, i32) {
    %c0_i32 = arith.constant 0 : i32
    %c0_i32_0 = arith.constant 0 : i32
    return %arg0, %c0_i32 : i32, i32
  }
}

</mosaic_0001>

<bundles_post_ra>
// kernel: tpu_custom_call.1
= control target key start
LH: loop header
LB: loop body
LE: loop exit
PB: predicated region body
PF: predicated region fallthrough
CT: control target
= control target key end

     0   :  { %8 = vsyncpa [#allocation4], 0  ;;  %s429_s0 = inlined_call_operand.hbm [shape: f32[16,128], index: 0, kind: input, shape index: {}]   ;;  %s430_s1 = inlined_call_operand.hbm [shape: f32[128,128], index: 1, kind: input, shape index: {}]   ;;  %s431_s2 = inlined_call_operand.vmem [shape: f32[1,128], index: 2, kind: input, shape index: {}]   ;;  %s432_s3 = inlined_call_operand.hbm [shape: f32[16,128], index: 3, kind: output, shape index: {}]  }
   0x1   :  { %9 = vsyncpa [#allocation7], 0 }
   0x2   :  { %10 = vsyncpa [#allocation5], 0  ;;  %s356_s12 = smov [#allocation3]   ;;  %s284_s16 = scalar_lea.hbm %s429_s0, 256 }
   0x3   :  { %s16_s13 = sshll.u32 %s356_s12, 4  ;;  %p285_p0 = scmp.ne.s32.totalorder %s429_s0, %s284_s16  ;;  %s17_s13 = int_to_ptr.vmem [resolvable:$true] %s16_s13 }
   0x4   :  { %p288_p1 = scmp.lt.u32.totalorder %s284_s16, %s429_s0 }
   0x6   :  { %p290_p2 = pnand %p288_p1, %p285_p0 }
   0x8   :  { %293 = shalt.err (!%p290_p2)
}
   0x9   :  { %s294_s21 = scalar_lea.vmem %s17_s13, 256  ;;  %p299_p4 = scmp.lt.s32.totalorder %s17_s13, %s17_s13 }
   0xa   :  { %p295_p3 = scmp.ne.s32.totalorder %s17_s13, %s294_s21  ;;  %p300_p5 = scmp.lt.s32.totalorder %s294_s21, %s294_s21 }
   0xc   :  { %p301_p6 = por %p300_p5, %p299_p4 }
   0xe   :  { %p302_p7 = pnand %p301_p6, %p295_p3 }
  0x10   :  { %305 = shalt.err (!%p302_p7)
}
  0x11   :  { %s357_s22 = smov 128   ;;  %s358_s23 = smov 8  }
  0x12   :  { %22 = dma.hbm_to_vmem [thread:$0]  %s429_s0, 256, %s17_s13, [#allocation4], %s357_s22, %s357_s22, %s358_s23  }
  0x13   :  { %s359_s26 = smov [#allocation6]   ;;  %s306_s30 = scalar_lea.hbm %s430_s1, 2048 }
  0x14   :  { %s28_s27 = sshll.u32 %s359_s26, 4  ;;  %p307_p8 = scmp.ne.s32.totalorder %s430_s1, %s306_s30  ;;  %s29_s27 = int_to_ptr.vmem [resolvable:$true] %s28_s27 }
  0x15   :  { %p310_p9 = scmp.lt.u32.totalorder %s306_s30, %s430_s1 }
  0x17   :  { %p312_p10 = pnand %p310_p9, %p307_p8 }
  0x19   :  { %315 = shalt.err (!%p312_p10)
}
  0x1a   :  { %s316_s8 = scalar_lea.vmem %s29_s27, 2048  ;;  %p321_p12 = scmp.lt.s32.totalorder %s29_s27, %s29_s27 }
  0x1b   :  { %p317_p11 = scmp.ne.s32.totalorder %s29_s27, %s316_s8  ;;  %p322_p13 = scmp.lt.s32.totalorder %s316_s8, %s316_s8 }
  0x1d   :  { %p323_p0 = por %p322_p13, %p321_p12 }
  0x1f   :  { %p324_p1 = pnand %p323_p0, %p317_p11 }
  0x21   :  { %327 = shalt.err (!%p324_p1)
}
  0x22   :  { %34 = dma.hbm_to_vmem [thread:$0]  %s430_s1, 2048, %s29_s27, [#allocation7], %s357_s22, %s357_s22, %s358_s23  }
  0x23   :  { %350 = dma.done.wait [#allocation4], 256  }
  0x24   :  { %351 = vsyncadd [#allocation4], 4294967040 }
  0x25   :  { %352 = dma.done.wait [#allocation7], 2048  }
  0x26   :  { %353 = vsyncadd [#allocation7], 4294965248  ;;  %v53_v0 = vld [vmem:[#allocation6] sm:$0xff]  ;;  %v54_v1 = vld [vmem:[#allocation6 + $0x8] sm:$0xff]  ;;  %s360_s11 = smov [#allocation8]  }
  0x27   :  { %v55_v2 = vld [vmem:[#allocation6 + $0x10] sm:$0xff]  ;;  %v247_v3 = vpack.c.bf16 %v54_v1, %v53_v0  ;;  %v56_v4 = vld [vmem:[#allocation6 + $0x18] sm:$0xff]  ;;  %v57_v6 = vld [vmem:[#allocation6 + $0x20] sm:$0xff]  ;;  %s179_s12 = sshll.u32 %s360_s11, 4  ;;  %s180_s12 = int_to_ptr.vmem [resolvable:$true] %s179_s12 }
  0x28   :  { %v251_v5 = vpack.c.bf16 %v56_v4, %v55_v2  ;;  %v58_v7 = vld [vmem:[#allocation6 + $0x28] sm:$0xff]  ;;  %v49_v9 = vld [vmem:[#allocation3] sm:$0xff]  ;;  %v60_v11 = vld [vmem:[#allocation6 + $0x38] sm:$0xff]  ;;  %s328_s13 = scalar_lea.vmem %s180_s12, 256  ;;  %p333_p3 = scmp.lt.s32.totalorder %s180_s12, %s180_s12 }
  0x29   :  { %248 = vmatprep.subr.bf16.mxu0 %v247_v3  ;;  %v255_v8 = vpack.c.bf16 %v58_v7, %v57_v6  ;;  %v59_v10 = vld [vmem:[#allocation6 + $0x30] sm:$0xff]  ;;  %244 = vmatprep.mubr.f32.mxu0 %v49_v9  ;;  %v61_v13 = vld [vmem:[#allocation6 + $0x40] sm:$0xff]  ;;  %v62_v14 = vld [vmem:[#allocation6 + $0x48] sm:$0xff]  ;;  %p329_p2 = scmp.ne.s32.totalorder %s180_s12, %s328_s13  ;;  %p334_p4 = scmp.lt.s32.totalorder %s328_s13, %s328_s13 }
  0x2a   :  { %250 = vmatpush3.bf16.msra.mxu0 %v247_v3  ;;  %v259_v12 = vpack.c.bf16 %v60_v11, %v59_v10  ;;  %v263_v15 = vpack.c.bf16 %v62_v14, %v61_v13  ;;  %v63_v16 = vld [vmem:[#allocation6 + $0x50] sm:$0xff]  ;;  %v64_v17 = vld [vmem:[#allocation6 + $0x58] sm:$0xff]  ;;  %v65_v19 = vld [vmem:[#allocation6 + $0x60] sm:$0xff] }
  0x2b   :  { %252 = vmatprep.subr.bf16.mxu0 %v251_v5  ;;  %v267_v18 = vpack.c.bf16 %v64_v17, %v63_v16  ;;  %v66_v20 = vld [vmem:[#allocation6 + $0x68] sm:$0xff]  ;;  %v67_v22 = vld [vmem:[#allocation6 + $0x70] sm:$0xff]  ;;  %v68_v23 = vld [vmem:[#allocation6 + $0x78] sm:$0xff]  ;;  %p335_p5 = por %p334_p4, %p333_p3 }
  0x2c   :  { %v271_v21 = vpack.c.bf16 %v66_v20, %v65_v19  ;;  %v275_v24 = vpack.c.bf16 %v68_v23, %v67_v22  ;;  %v50_v25 = vld [vmem:[#allocation3 + $0x8] sm:$0xff]  ;;  %v193_v27 = vld [vmem:[%s431_s2] ss:$0 sm:$0xff] }
  0x2d   :  { %p336_p6 = pnand %p335_p5, %p329_p2 }
  0x2e   :  { %254 = vmatpush3.bf16.msra.mxu0 %v251_v5 }
  0x2f   :  { %256 = vmatprep.subr.bf16.mxu0 %v255_v8 }
  0x32   :  { %258 = vmatpush3.bf16.msra.mxu0 %v255_v8 }
  0x33   :  { %260 = vmatprep.subr.bf16.mxu0 %v259_v12 }
  0x36   :  { %262 = vmatpush3.bf16.msra.mxu0 %v259_v12 }
  0x37   :  { %264 = vmatprep.subr.bf16.mxu0 %v263_v15 }
  0x3a   :  { %266 = vmatpush3.bf16.msra.mxu0 %v263_v15 }
  0x3b   :  { %268 = vmatprep.subr.bf16.mxu0 %v267_v18 }
  0x3e   :  { %270 = vmatpush3.bf16.msra.mxu0 %v267_v18 }
  0x3f   :  { %272 = vmatprep.subr.bf16.mxu0 %v271_v21 }
  0x42   :  { %274 = vmatpush3.bf16.msra.mxu0 %v271_v21 }
  0x43   :  { %276 = vmatprep.subr.bf16.mxu0 %v275_v24 }
  0x46   :  { %278 = vmatpush3.bf16.msra.mxu0 %v275_v24 }
  0x49   :  { %245 = vmatmul.mubr.f32.vlgmr.msra.gmra.mrb[0].mxu0 %v50_v25 }
 0x11c   :  { %v246_v26 = vpop.f32.mrb[0].mxu0 }
 0x11d   :  { %v155_v28 = vadd.f32 %v246_v26, %v50_v25  ;;  %v135_v29 = vpop.f32.mrb[1].mxu0 }
 0x11e   :  { %v154_v30 = vadd.f32 %v135_v29, %v49_v9 }
 0x11f   :  { %v171_v31 = vadd.f32 %v193_v27, %v155_v28 }
 0x120   :  { %v170_v32 = vadd.f32 %v193_v27, %v154_v30 }
 0x121   :  { %173 = vst [vmem:[#allocation8 + $0x8] sm:$0xff] %v171_v31 }
 0x122   :  { %172 = vst [vmem:[#allocation8] sm:$0xff] %v170_v32 }
 0x123   :  { %339 = shalt.err (!%p336_p6)
}
 0x124   :  { %s340_s2 = scalar_lea.hbm %s432_s3, 256 }
 0x125   :  { %p341_p7 = scmp.ne.s32.totalorder %s432_s3, %s340_s2  ;;  %p344_p8 = scmp.lt.u32.totalorder %s340_s2, %s432_s3 }
 0x127   :  { %p346_p9 = pnand %p344_p8, %p341_p7 }
 0x129   :  { %349 = shalt.err (!%p346_p9)
}
 0x12a   :  { %185 = dma.vmem_to_hbm [thread:$0]  %s180_s12, 256, %s432_s3, [#allocation5], %s357_s22, %s357_s22, %s358_s23  }
 0x12b   :  { %354 = dma.done.wait [#allocation5], 256  }
 0x12c   :  { %355 = vsyncadd [#allocation5], 4294967040 }
 0x12d   :  { %189 = vsyncpa [#allocation4], 1 }
 0x12e   :  { %190 = vsyncpa [#allocation7], 1 }
 0x12f   :  { %191 = vsyncpa [#allocation5], 1 }

</bundles_post_ra>
